<compile_context>
chip_gen: v7x
topology: tpu7x:2x2x1
jax: 0.10.0
libtpu: 0.0.40
codegen_flags: <defaults>
</compile_context>

<pallas_src>
import functools

import jax
import jax.numpy as jnp
from jax import lax
from jax.experimental import pallas as pl
from jax.experimental.pallas import tpu as pltpu

IMAGENET_DEFAULT_STD = (0.229, 0.224, 0.225)


def _denorm_mse_kernel(x_ref, y_ref, s_ref, o_ref, acc_ref, *,
                       cols, tile_cols, inner_tiles, need_mask):
    ci = pl.program_id(0)   # parallel chunk axis (megacore on v7x)
    j = pl.program_id(1)    # reduction axis over column tiles

    @pl.when(j == 0)
    def _():
        acc_ref[...] = jnp.zeros_like(acc_ref)

    # Elementwise hot path: scaled diff, square, accumulate (VPU only).
    d = (x_ref[...] - y_ref[...]) * s_ref[...]      # s broadcasts (rows, 1)
    if need_mask:
        tile_idx = ci * inner_tiles + j
        col = tile_idx * tile_cols + lax.broadcasted_iota(
            jnp.int32, d.shape, dimension=1)
        d = jnp.where(col < cols, d, 0.0)
    acc_ref[...] = acc_ref[...] + d * d

    # One cross-lane/sublane reduction per chunk, only on the final step.
    @pl.when(j == pl.num_programs(1) - 1)
    def _():
        o_ref[...] = jnp.broadcast_to(jnp.sum(acc_ref[...]), o_ref.shape)


def _pick_tile_cols(cols, rows, target, block_budget_bytes):
    """Largest lane-multiple tile fitting the VMEM budget; prefers exact divisors."""
    # ~5 live (rows, tile_cols) f32 blocks: 2 inputs x 2 buffers + accumulator.
    max_by_vmem = block_budget_bytes // (5 * rows * 4)
    tc = min(target, max_by_vmem)
    tc = max(128, (tc // 128) * 128)
    # No point tiling wider than the lane-rounded column extent.
    tc = min(tc, max(128, pl.cdiv(cols, 128) * 128))
    if cols % 128 == 0:
        for cand in range(tc, 127, -128):
            if cols % cand == 0:
                return cand        # exact divisor -> no tail masking needed
    return tc


def denormalized_mse_loss(x, y, scale=255.0, *, tile_cols=2048,
                          num_parallel_chunks=2):
    """x, y: NCHW arrays with C == 3. Returns scalar f32 loss."""
    n, c, h, w = x.shape
    assert c == len(IMAGENET_DEFAULT_STD)
    rows = n * c
    cols = h * w

    x2 = x.reshape(rows, cols).astype(jnp.float32)
    y2 = y.reshape(rows, cols).astype(jnp.float32)

    # Per-row multiplier: std[channel] * scale, shape (rows, 1).
    std = jnp.asarray(IMAGENET_DEFAULT_STD, dtype=jnp.float32)
    row_scale = jnp.tile(std, n).reshape(rows, 1) * jnp.float32(scale)

    tc = _pick_tile_cols(cols, rows, tile_cols, block_budget_bytes=16 << 20)
    total_tiles = pl.cdiv(cols, tc)
    num_chunks = max(1, min(num_parallel_chunks, total_tiles))
    inner_tiles = pl.cdiv(total_tiles, num_chunks)
    need_mask = (num_chunks * inner_tiles * tc) != cols
    last_block = total_tiles - 1

    def col_map(ci, j):
        # Clamp so padded chunk steps / tail tiles never address an
        # out-of-range block; the in-kernel mask zeroes their contribution.
        return (0, jnp.minimum(ci * inner_tiles + j, last_block))

    kernel = functools.partial(
        _denorm_mse_kernel,
        cols=cols, tile_cols=tc, inner_tiles=inner_tiles, need_mask=need_mask)

    partials = pl.pallas_call(
        kernel,
        out_shape=jax.ShapeDtypeStruct((num_chunks, 1, 128), jnp.float32),
        grid_spec=pltpu.PrefetchScalarGridSpec(
            num_scalar_prefetch=0,
            grid=(num_chunks, inner_tiles),
            in_specs=[
                pl.BlockSpec((rows, tc), col_map),
                pl.BlockSpec((rows, tc), col_map),
                pl.BlockSpec((rows, 1), lambda ci, j: (0, 0)),
            ],
            out_specs=pl.BlockSpec((1, 1, 128), lambda ci, j: (ci, 0, 0)),
            scratch_shapes=[pltpu.VMEM((rows, tc), jnp.float32)],
        ),
        compiler_params=pltpu.CompilerParams(
            dimension_semantics=("parallel", "arbitrary"),
            vmem_limit_bytes=32 * 1024 * 1024,
        ),
    )(x2, y2, row_scale)

    total_count = float(n * c * h * w)
    # Each chunk's scalar partial is broadcast across 128 lanes; take lane 0.
    return jnp.sum(partials[:, 0, 0]) / total_count


def _reference(x, y, scale=255.0):
    std = jnp.asarray(IMAGENET_DEFAULT_STD, dtype=jnp.float32).reshape(1, 3, 1, 1)
    diff = (x.astype(jnp.float32) - y.astype(jnp.float32)) * std * scale
    return jnp.mean(diff ** 2)


if __name__ == "__main__":
    key = jax.random.PRNGKey(0)
    kx, ky = jax.random.split(key)
    # Small NCHW shapes consistent with the module (C must be 3).
    x = jax.random.normal(kx, (2, 3, 16, 16), dtype=jnp.float32)
    y = jax.random.normal(ky, (2, 3, 16, 16), dtype=jnp.float32)

    loss = denormalized_mse_loss(x, y, scale=255.0)
    loss = jax.block_until_ready(loss)

    ref = _reference(x, y, scale=255.0)
    assert jnp.allclose(loss, ref, rtol=1e-5, atol=1e-3), (loss, ref)
    print("KERNEL_OK")
</pallas_src>

<mosaic_0001>
module attributes {stable_mosaic.version = 11 : i64} {
  func.func @_denorm_mse_kernel(%arg0: i32, %arg1: i32, %arg2: memref<6x256xf32, #tpu.memory_space<vmem>>, %arg3: memref<6x256xf32, #tpu.memory_space<vmem>>, %arg4: memref<6x1xf32, #tpu.memory_space<vmem>>, %arg5: memref<1x1x128xf32, #tpu.memory_space<vmem>>, %arg6: memref<6x256xf32, #tpu.memory_space<vmem>>) attributes {dimension_semantics = [#tpu.dimension_semantics<parallel>, #tpu.dimension_semantics<arbitrary>], iteration_bounds = array<i64: 1, 1>, scalar_prefetch = 0 : i64, scratch_operands = 1 : i64, tpu.core_type = #tpu.core_type<tc>, window_params = [{transform_indices = @transform_0, window_bounds = array<i64: 6, 256>}, {transform_indices = @transform_1, window_bounds = array<i64: 6, 256>}, {pipeline_mode = #tpu.pipeline_mode<synchronous>, transform_indices = @transform_2, window_bounds = array<i64: 6, 1>}, {transform_indices = @transform_3, window_bounds = array<i64: 1, 1, 128>}]} {
    %c0_i32 = arith.constant 0 : i32
    %0 = arith.cmpi eq, %arg1, %c0_i32 : i32
    %1 = arith.extui %0 : i1 to i32
    %c0_i32_0 = arith.constant 0 : i32
    %2 = arith.cmpi ne, %1, %c0_i32_0 : i32
    scf.if %2 {
      %cst = arith.constant 0.000000e+00 : f32
      %16 = vector.broadcast %cst : f32 to vector<6x256xf32>
      %c0_12 = arith.constant 0 : index
      %c0_13 = arith.constant 0 : index
      %17 = vector.load %arg6[%c0_12, %c0_13] : memref<6x256xf32, #tpu.memory_space<vmem>>, vector<6x256xf32>
      tpu.vector_store %arg6[%c0_12, %c0_13], %16 {strides = array<i32>} : memref<6x256xf32, #tpu.memory_space<vmem>>, vector<6x256xf32>,
    } else {
    }
    %c0 = arith.constant 0 : index
    %c0_1 = arith.constant 0 : index
    %3 = vector.load %arg2[%c0, %c0_1] : memref<6x256xf32, #tpu.memory_space<vmem>>, vector<6x256xf32>
    %c0_2 = arith.constant 0 : index
    %c0_3 = arith.constant 0 : index
    %4 = vector.load %arg3[%c0_2, %c0_3] : memref<6x256xf32, #tpu.memory_space<vmem>>, vector<6x256xf32>
    %5 = arith.subf %3, %4 : vector<6x256xf32>
    %c0_4 = arith.constant 0 : index
    %c0_5 = arith.constant 0 : index
    %6 = vector.load %arg4[%c0_4, %c0_5] : memref<6x1xf32, #tpu.memory_space<vmem>>, vector<6x1xf32>
    %7 = vector.broadcast %6 : vector<6x1xf32> to vector<6x256xf32>
    %8 = arith.mulf %5, %7 : vector<6x256xf32>
    %c0_6 = arith.constant 0 : index
    %c0_7 = arith.constant 0 : index
    %9 = vector.load %arg6[%c0_6, %c0_7] : memref<6x256xf32, #tpu.memory_space<vmem>>, vector<6x256xf32>
    %10 = arith.mulf %8, %8 : vector<6x256xf32>
    %11 = arith.addf %9, %10 : vector<6x256xf32>
    %c0_8 = arith.constant 0 : index
    %c0_9 = arith.constant 0 : index
    %12 = vector.load %arg6[%c0_8, %c0_9] : memref<6x256xf32, #tpu.memory_space<vmem>>, vector<6x256xf32>
    tpu.vector_store %arg6[%c0_8, %c0_9], %11 {strides = array<i32>} : memref<6x256xf32, #tpu.memory_space<vmem>>, vector<6x256xf32>,
    %c0_i32_10 = arith.constant 0 : i32
    %13 = arith.cmpi eq, %arg1, %c0_i32_10 : i32
    %14 = arith.extui %13 : i1 to i32
    %c0_i32_11 = arith.constant 0 : i32
    %15 = arith.cmpi ne, %14, %c0_i32_11 : i32
    scf.if %15 {
      %c0_12 = arith.constant 0 : index
      %c0_13 = arith.constant 0 : index
      %16 = vector.load %arg6[%c0_12, %c0_13] : memref<6x256xf32, #tpu.memory_space<vmem>>, vector<6x256xf32>
      %17 = vector.shape_cast %16 : vector<6x256xf32> to vector<1x6x256xf32>
      %cst = arith.constant dense<0.000000e+00> : vector<1xf32>
      %18 = vector.multi_reduction <add>, %17, %cst [1, 2] : vector<1x6x256xf32> to vector<1xf32>
      %19 = vector.shape_cast %18 : vector<1xf32> to vector<1x1x1xf32>
      %20 = vector.extract %19[0, 0, 0] : f32 from vector<1x1x1xf32>
      %21 = vector.broadcast %20 : f32 to vector<1x1x128xf32>
      %c0_14 = arith.constant 0 : index
      %c0_15 = arith.constant 0 : index
      %c0_16 = arith.constant 0 : index
      %22 = vector.load %arg5[%c0_14, %c0_15, %c0_16] : memref<1x1x128xf32, #tpu.memory_space<vmem>>, vector<1x1x128xf32>
      tpu.vector_store %arg5[%c0_14, %c0_15, %c0_16], %21 {strides = array<i32>} : memref<1x1x128xf32, #tpu.memory_space<vmem>>, vector<1x1x128xf32>,
    } else {
    }
    return
  }
  func.func @transform_0(%arg0: i32, %arg1: i32) -> (i32, i32) {
    %c1_i32 = arith.constant 1 : i32
    %0 = arith.muli %arg0, %c1_i32 : i32
    %1 = arith.addi %0, %arg1 : i32
    %c0_i32 = arith.constant 0 : i32
    %2 = arith.minsi %1, %c0_i32 : i32
    %c0_i32_0 = arith.constant 0 : i32
    %c0_i32_1 = arith.constant 0 : i32
    return %c0_i32_0, %2 : i32, i32
  }
  func.func @transform_1(%arg0: i32, %arg1: i32) -> (i32, i32) {
    %c1_i32 = arith.constant 1 : i32
    %0 = arith.muli %arg0, %c1_i32 : i32
    %1 = arith.addi %0, %arg1 : i32
    %c0_i32 = arith.constant 0 : i32
    %2 = arith.minsi %1, %c0_i32 : i32
    %c0_i32_0 = arith.constant 0 : i32
    %c0_i32_1 = arith.constant 0 : i32
    return %c0_i32_0, %2 : i32, i32
  }
  func.func @transform_2(%arg0: i32, %arg1: i32) -> (i32, i32) {
    %c0_i32 = arith.constant 0 : i32
    %c0_i32_0 = arith.constant 0 : i32
    %c0_i32_1 = arith.constant 0 : i32
    return %c0_i32, %c0_i32_0 : i32, i32
  }
  func.func @transform_3(%arg0: i32, %arg1: i32) -> (i32, i32, i32) {
    %c0_i32 = arith.constant 0 : i32
    %c0_i32_0 = arith.constant 0 : i32
    %c0_i32_1 = arith.constant 0 : i32
    return %arg0, %c0_i32, %c0_i32_0 : i32, i32, i32
  }
}

</mosaic_0001>

<bundles_post_ra>
// kernel: tpu_custom_call.1
= control target key start
LH: loop header
LB: loop body
LE: loop exit
PB: predicated region body
PF: predicated region fallthrough
CT: control target
= control target key end

     0   :  { %8 = vsyncpa [#allocation4], 0  ;;  %s271_s0 = inlined_call_operand.hbm [shape: f32[6,256], index: 0, kind: input, shape index: {}]   ;;  %s272_s1 = inlined_call_operand.hbm [shape: f32[6,256], index: 1, kind: input, shape index: {}]   ;;  %s273_s2 = inlined_call_operand.vmem [shape: f32[6,1], index: 2, kind: input, shape index: {}]   ;;  %s274_s3 = inlined_call_operand.hbm [shape: f32[1,1,128], index: 3, kind: output, shape index: {}]  }
   0x1   :  { %9 = vsyncpa [#allocation7], 0 }
   0x2   :  { %10 = vsyncpa [#allocation5], 0  ;;  %s207_s12 = smov [#allocation3]   ;;  %s208_s14 = smov [#allocation6]  }
   0x3   :  { %s23_s13 = sshll.u32 %s207_s12, 4  ;;  %s39_s15 = sshll.u32 %s208_s14, 4  ;;  %s24_s13 = int_to_ptr.vmem [resolvable:$true] %s23_s13  ;;  %s40_s15 = int_to_ptr.vmem [resolvable:$true] %s39_s15 }
   0x4   :  { %s135_s18 = scalar_lea.hbm %s271_s0, 256 }
   0x5   :  { %p136_p0 = scmp.ne.s32.totalorder %s271_s0, %s135_s18  ;;  %p139_p1 = scmp.lt.u32.totalorder %s135_s18, %s271_s0 }
   0x7   :  { %p141_p2 = pnand %p139_p1, %p136_p0 }
   0x9   :  { %144 = shalt.err (!%p141_p2)
}
   0xa   :  { %s145_s23 = scalar_lea.vmem %s24_s13, 256  ;;  %p150_p4 = scmp.lt.s32.totalorder %s24_s13, %s24_s13 }
   0xb   :  { %p146_p3 = scmp.ne.s32.totalorder %s24_s13, %s145_s23  ;;  %p151_p5 = scmp.lt.s32.totalorder %s145_s23, %s145_s23 }
   0xd   :  { %p152_p6 = por %p151_p5, %p150_p4 }
   0xf   :  { %p153_p7 = pnand %p152_p6, %p146_p3 }
  0x11   :  { %156 = shalt.err (!%p153_p7)
}
  0x12   :  { %26 = dma.hbm_to_vmem [thread:$0]  %s271_s0, 256, %s24_s13, [#allocation4]  }
  0x13   :  { %s157_s28 = scalar_lea.hbm %s272_s1, 256 }
  0x14   :  { %p158_p8 = scmp.ne.s32.totalorder %s272_s1, %s157_s28  ;;  %p161_p9 = scmp.lt.u32.totalorder %s157_s28, %s272_s1 }
  0x16   :  { %p163_p10 = pnand %p161_p9, %p158_p8 }
  0x18   :  { %166 = shalt.err (!%p163_p10)
}
  0x19   :  { %s167_s6 = scalar_lea.vmem %s40_s15, 256  ;;  %p172_p12 = scmp.lt.s32.totalorder %s40_s15, %s40_s15 }
  0x1a   :  { %p168_p11 = scmp.ne.s32.totalorder %s40_s15, %s167_s6  ;;  %p173_p13 = scmp.lt.s32.totalorder %s167_s6, %s167_s6 }
  0x1c   :  { %p174_p0 = por %p173_p13, %p172_p12 }
  0x1e   :  { %p175_p1 = pnand %p174_p0, %p168_p11 }
  0x20   :  { %178 = shalt.err (!%p175_p1)
}
  0x21   :  { %42 = dma.hbm_to_vmem [thread:$0]  %s272_s1, 256, %s40_s15, [#allocation7]  }
  0x22   :  { %201 = dma.done.wait [#allocation4], 256  }
  0x23   :  { %202 = vsyncadd [#allocation4], 4294967040 }
  0x24   :  { %203 = dma.done.wait [#allocation7], 256  }
  0x25   :  { %204 = vsyncadd [#allocation7], 4294967040  ;;  %v209_v0 = vmov 0   ;;  %v210_v1 = vmov 0.0   ;;  %v71_v2 = vld [vmem:[%s273_s2] sm:$0x3f] }
  0x26   :  { %134 = vset.pattern.permute.xlu0 %v209_v0  ;;  %63 = vst [vmem:[#allocation2] sm:$0x3f] %v210_v1  ;;  %64 = vst [vmem:[#allocation2 + $0x8] sm:$0x3f] %v210_v1  ;;  %v65_v3 = vld [vmem:[#allocation3] sm:$0x3f] }
  0x27   :  { %74 = vperm.xlu0 %134, %v71_v2   ;;  %v66_v4 = vld [vmem:[#allocation3 + $0x8] sm:$0x3f]  ;;  %v67_v5 = vld [vmem:[#allocation6] sm:$0x3f]  ;;  %v68_v6 = vld [vmem:[#allocation6 + $0x8] sm:$0x3f] }
  0x28   :  { %v69_v7 = vsub.f32 %v65_v3, %v67_v5  ;;  %v70_v8 = vsub.f32 %v66_v4, %v68_v6  ;;  %vm92_vm0 = vcmask 1045504   ;;  %s211_s1 = smov [#allocation8]  }
  0x29   :  { %s113_s2 = sshll.u32 %s211_s1, 4  ;;  %s114_s2 = int_to_ptr.vmem [resolvable:$true] %s113_s2 }
  0x2a   :  { %s179_s11 = scalar_lea.vmem %s114_s2, 16  ;;  %s183_s12 = scalar_lea.vmem %s114_s2, 32 }
  0x2b   :  { %p180_p2 = scmp.ne.s32.totalorder %s114_s2, %s179_s11  ;;  %p184_p3 = scmp.lt.s32.totalorder %s114_s2, %s114_s2 }
  0x2c   :  { %p185_p4 = scmp.lt.s32.totalorder %s183_s12, %s179_s11 }
  0x2d   :  { %v79_v12 = vld [vmem:[#allocation2] sm:$0x3f]  ;;  %v80_v13 = vld [vmem:[#allocation2 + $0x8] sm:$0x3f] }
  0x2e   :  { %p186_p5 = por %p185_p4, %p184_p3 }
  0x30   :  { %p187_p6 = pnand %p186_p5, %p180_p2 }
  0xa6   :  { %v75_v9 = vpop.permute.xlu0 %74 }
  0xa7   :  { %v77_v10 = vmul.f32 %v75_v9, %v69_v7  ;;  %v78_v11 = vmul.f32 %v75_v9, %v70_v8 }
  0xa9   :  { %v81_v14 = vmul.f32 %v77_v10, %v77_v10  ;;  %v82_v15 = vmul.f32 %v78_v11, %v78_v11 }
  0xab   :  { %v83_v16 = vadd.f32 %v81_v14, %v79_v12  ;;  %v84_v17 = vadd.f32 %v82_v15, %v80_v13 }
  0xad   :  { %85 = vst [vmem:[#allocation2] sm:$0x3f] %v83_v16  ;;  %86 = vst [vmem:[#allocation2 + $0x8] sm:$0x3f] %v84_v17 }
  0xb4   :  { %v90_v18 = vld [vmem:[#allocation2] sm:$0x3f]  ;;  %v91_v19 = vld [vmem:[#allocation2 + $0x8] sm:$0x3f] }
  0xb5   :  { %v93_v20 = vsel %vm92_vm0, %v90_v18, 0.0  ;;  %v94_v21 = vsel %vm92_vm0, %v91_v19, 0.0 }
  0xb6   :  { %v95_v22 = vadd.f32 %v94_v21, %v93_v20 }
  0xb8   :  { %96 = vadd.xlane.f32.xlu0 %v95_v22 }
 0x145   :  { %v97_v23 = vpop.xlane.xlu0 %96 }
 0x146   :  { %v98_v24 = vrot.slane %v97_v23, 4 }
 0x148   :  { %v99_v25 = vadd.f32 %v98_v24, %v97_v23 }
 0x14a   :  { %v100_v26 = vrot.slane %v99_v25, 2 }
 0x14c   :  { %v101_v27 = vadd.f32 %v100_v26, %v99_v25 }
 0x14e   :  { %v102_v28 = vrot.slane %v101_v27, 1 }
 0x150   :  { %v103_v29 = vadd.f32 %v102_v28, %v101_v27 }
 0x152   :  { %127 = vpush %v103_v29 }
 0x183   :  { %s128_s10 = spop %127 }
 0x184   :  { %v105_v30 = vstv %s128_s10 }
 0x185   :  { %106 = vst [vmem:[#allocation8] sm:$0x1] %v105_v30 }
 0x186   :  { %190 = shalt.err (!%p187_p6)
}
 0x187   :  { %s191_s15 = scalar_lea.hbm %s274_s3, 16 }
 0x188   :  { %p192_p7 = scmp.ne.s32.totalorder %s274_s3, %s191_s15  ;;  %p195_p8 = scmp.lt.u32.totalorder %s191_s15, %s274_s3 }
 0x18a   :  { %p197_p9 = pnand %p195_p8, %p192_p7 }
 0x18c   :  { %200 = shalt.err (!%p197_p9)
}
 0x18d   :  { %116 = dma.vmem_to_hbm [thread:$0]  %s114_s2, 16, %s274_s3, [#allocation5]  }
 0x18e   :  { %205 = dma.done.wait [#allocation5], 16  }
 0x18f   :  { %206 = vsyncadd [#allocation5], 4294967280 }
 0x190   :  { %120 = vsyncpa [#allocation4], 1 }
 0x191   :  { %121 = vsyncpa [#allocation7], 1 }
 0x192   :  { %122 = vsyncpa [#allocation5], 1 }

</bundles_post_ra>
